<compile_context>
chip_gen: v7x
topology: tpu7x:2x2x1
jax: 0.10.0
libtpu: 0.0.40
codegen_flags: <defaults>
</compile_context>

<pallas_src>
import jax
import jax.numpy as jnp
from jax.experimental import pallas as pl
from jax.experimental.pallas import tpu as pltpu


def _round_up(n, m):
    return ((n + m - 1) // m) * m


def _mlp_kernel(*refs):
    """Fused MLP body. refs = (x, W0, b0, W1, b1, ..., Wn, bn, out)."""
    x_ref = refs[0]
    out_ref = refs[-1]
    param_refs = refs[1:-1]
    n_layers = len(param_refs) // 2

    h = x_ref[...]
    if h.dtype != jnp.float32:
        h = h.astype(jnp.float32)

    for i in range(n_layers):
        w = param_refs[2 * i][...]           # (in, out)  — VMEM-resident
        b = param_refs[2 * i + 1][...]       # (1, out)
        if b.dtype != jnp.float32:
            b = b.astype(jnp.float32)
        h = jnp.dot(h, w, preferred_element_type=jnp.float32) + b
        if i < n_layers - 1:                 # ReLU on h_0 / h_mid, not on `out`
            h = jnp.maximum(h, 0.0)

    out_ref[...] = h.astype(out_ref.dtype)


def mlp_forward(x, params, *, block_batch=512):
    """x: (batch, emb_dim + 10). params: list of (W_(in,out), b_(1,out)) pairs.

    Returns (batch, emb_dim), matching the PyTorch module's forward.
    """
    batch, in_dim = x.shape
    emb_dim = params[-1][0].shape[1]

    # ---- lane-dense output: zero-pad the final layer to >=128 output lanes ----
    out_pad = _round_up(max(emb_dim, 128), 128)
    w_out, b_out = params[-1]
    w_out_p = jnp.zeros((w_out.shape[0], out_pad), w_out.dtype).at[:, :emb_dim].set(w_out)
    b_out_p = jnp.zeros((1, out_pad), b_out.dtype).at[:, :emb_dim].set(b_out)
    padded_params = list(params[:-1]) + [(w_out_p, b_out_p)]

    # ---- batch tiling: TB is a multiple of 256 (fills MXU M on all gens),
    #      batch is zero-padded to a TB multiple so the last tile never runs OOB.
    tb = min(_round_up(block_batch, 256), _round_up(batch, 256))
    padded_batch = _round_up(batch, tb)
    if padded_batch != batch:
        x = jnp.pad(x, ((0, padded_batch - batch), (0, 0)))
    grid = (padded_batch // tb,)

    flat = []
    for w, b in padded_params:
        flat.extend([w, b])

    in_specs = [pl.BlockSpec((tb, in_dim), lambda i: (i, 0))]
    for w, b in padded_params:
        # Full-array blocks with a constant index map: weights stay resident.
        in_specs.append(pl.BlockSpec(w.shape, lambda i: (0, 0)))
        in_specs.append(pl.BlockSpec(b.shape, lambda i: (0, 0)))
    out_spec = pl.BlockSpec((tb, out_pad), lambda i: (i, 0))

    # ---- advisory cost estimate so XLA overlaps this custom call sensibly ----
    itemsize = x.dtype.itemsize
    flops = 0
    bytes_accessed = padded_batch * in_dim * itemsize + padded_batch * out_pad * itemsize
    for w, b in padded_params:
        flops += 2 * padded_batch * w.shape[0] * w.shape[1]
        bytes_accessed += w.size * w.dtype.itemsize + b.size * b.dtype.itemsize
    cost = pl.CostEstimate(flops=int(flops), transcendentals=0,
                           bytes_accessed=int(bytes_accessed))

    y_padded = pl.pallas_call(
        _mlp_kernel,
        out_shape=jax.ShapeDtypeStruct((padded_batch, out_pad), x.dtype),
        grid=grid,
        in_specs=in_specs,
        out_specs=out_spec,
        compiler_params=pltpu.CompilerParams(
            # v7x: shard batch tiles across both TensorCores; no-op on v5e/v6e.
            dimension_semantics=("parallel",),
        ),
        cost_estimate=cost,
    )(x, *flat)

    return y_padded[:batch, :emb_dim]


def init_params(key, emb_dim, neurons_per_layer, hidden_layers, dtype=jnp.float32):
    """Deterministic synthetic init (shapes match the PyTorch module).

    dtype=jnp.bfloat16 is a drop-in on v6e/v7x to halve weight/activation DMA;
    the kernel still accumulates in f32.
    """
    dims = [emb_dim + 10] + [neurons_per_layer] * hidden_layers + [emb_dim]
    params = []
    for i in range(len(dims) - 1):
        key, kw, kb = jax.random.split(key, 3)
        fan_in, fan_out = dims[i], dims[i + 1]
        bound = 1.0 / jnp.sqrt(fan_in)
        # Stored pre-transposed as (in, out); equivalent to torch's W^T.
        w = jax.random.uniform(kw, (fan_in, fan_out), jnp.float32, -bound, bound).astype(dtype)
        b = jax.random.uniform(kb, (1, fan_out), jnp.float32, -bound, bound).astype(dtype)
        params.append((w, b))
    return params


def mlp_reference(x, params):
    """Plain-JAX reference for correctness check."""
    h = x.astype(jnp.float32)
    for i, (w, b) in enumerate(params):
        h = jnp.dot(h, w.astype(jnp.float32),
                    preferred_element_type=jnp.float32) + b.astype(jnp.float32)
        if i < len(params) - 1:
            h = jnp.maximum(h, 0.0)
    return h


if __name__ == "__main__":
    # Small config consistent with the module: emb_dim=16, neurons=32, 3 hidden layers.
    emb_dim = 16
    neurons_per_layer = 32
    hidden_layers = 3
    batch = 64  # wrapper pads to the 256-row batch tile internally

    key = jax.random.PRNGKey(0)
    key, kx = jax.random.split(key)
    x = jax.random.normal(kx, (batch, emb_dim + 10), jnp.float32)

    params = init_params(key, emb_dim, neurons_per_layer, hidden_layers)

    y = jax.block_until_ready(mlp_forward(x, params, block_batch=256))
    y_ref = mlp_reference(x, params)

    assert y.shape == (batch, emb_dim)
    assert jnp.allclose(y, y_ref, atol=1e-5, rtol=1e-5), "mismatch vs reference"

    print("KERNEL_OK")
</pallas_src>

<mosaic_0001>
module attributes {stable_mosaic.version = 11 : i64} {
  func.func @_mlp_kernel(%arg0: i32, %arg1: memref<256x26xf32, #tpu.memory_space<vmem>>, %arg2: memref<26x32xf32, #tpu.memory_space<vmem>>, %arg3: memref<1x32xf32, #tpu.memory_space<vmem>>, %arg4: memref<32x32xf32, #tpu.memory_space<vmem>>, %arg5: memref<1x32xf32, #tpu.memory_space<vmem>>, %arg6: memref<32x32xf32, #tpu.memory_space<vmem>>, %arg7: memref<1x32xf32, #tpu.memory_space<vmem>>, %arg8: memref<32x128xf32, #tpu.memory_space<vmem>>, %arg9: memref<1x128xf32, #tpu.memory_space<vmem>>, %arg10: memref<256x128xf32, #tpu.memory_space<vmem>>) attributes {dimension_semantics = [#tpu.dimension_semantics<parallel>], iteration_bounds = array<i64: 1>, scalar_prefetch = 0 : i64, scratch_operands = 0 : i64, tpu.core_type = #tpu.core_type<tc>, window_params = [{transform_indices = @transform_0, window_bounds = array<i64: 256, 26>}, {pipeline_mode = #tpu.pipeline_mode<synchronous>, transform_indices = @transform_1, window_bounds = array<i64: 26, 32>}, {pipeline_mode = #tpu.pipeline_mode<synchronous>, transform_indices = @transform_2, window_bounds = array<i64: 1, 32>}, {pipeline_mode = #tpu.pipeline_mode<synchronous>, transform_indices = @transform_3, window_bounds = array<i64: 32, 32>}, {pipeline_mode = #tpu.pipeline_mode<synchronous>, transform_indices = @transform_4, window_bounds = array<i64: 1, 32>}, {pipeline_mode = #tpu.pipeline_mode<synchronous>, transform_indices = @transform_5, window_bounds = array<i64: 32, 32>}, {pipeline_mode = #tpu.pipeline_mode<synchronous>, transform_indices = @transform_6, window_bounds = array<i64: 1, 32>}, {pipeline_mode = #tpu.pipeline_mode<synchronous>, transform_indices = @transform_7, window_bounds = array<i64: 32, 128>}, {pipeline_mode = #tpu.pipeline_mode<synchronous>, transform_indices = @transform_8, window_bounds = array<i64: 1, 128>}, {transform_indices = @transform_9, window_bounds = array<i64: 256, 128>}]} {
    %c0 = arith.constant 0 : index
    %c0_0 = arith.constant 0 : index
    %0 = vector.load %arg1[%c0, %c0_0] : memref<256x26xf32, #tpu.memory_space<vmem>>, vector<256x26xf32>
    %c0_1 = arith.constant 0 : index
    %c0_2 = arith.constant 0 : index
    %1 = vector.load %arg2[%c0_1, %c0_2] : memref<26x32xf32, #tpu.memory_space<vmem>>, vector<26x32xf32>
    %c0_3 = arith.constant 0 : index
    %c0_4 = arith.constant 0 : index
    %2 = vector.load %arg3[%c0_3, %c0_4] : memref<1x32xf32, #tpu.memory_space<vmem>>, vector<1x32xf32>
    %cst = arith.constant dense<0.000000e+00> : vector<256x32xf32>
    %3 = tpu.matmul %0, %1, %cst {dimension_numbers = #tpu.dot_dimension_numbers<[1], [0], [0], [1], [0, 0, 1, 1], [], []>} : vector<256x26xf32>, vector<26x32xf32>, vector<256x32xf32> -> vector<256x32xf32>
    %4 = vector.broadcast %2 : vector<1x32xf32> to vector<256x32xf32>
    %5 = arith.addf %3, %4 : vector<256x32xf32>
    %cst_5 = arith.constant 0.000000e+00 : f32
    %6 = vector.broadcast %cst_5 : f32 to vector<256x32xf32>
    %7 = arith.maximumf %5, %6 : vector<256x32xf32>
    %c0_6 = arith.constant 0 : index
    %c0_7 = arith.constant 0 : index
    %8 = vector.load %arg4[%c0_6, %c0_7] : memref<32x32xf32, #tpu.memory_space<vmem>>, vector<32x32xf32>
    %c0_8 = arith.constant 0 : index
    %c0_9 = arith.constant 0 : index
    %9 = vector.load %arg5[%c0_8, %c0_9] : memref<1x32xf32, #tpu.memory_space<vmem>>, vector<1x32xf32>
    %cst_10 = arith.constant dense<0.000000e+00> : vector<256x32xf32>
    %10 = tpu.matmul %7, %8, %cst_10 {dimension_numbers = #tpu.dot_dimension_numbers<[1], [0], [0], [1], [0, 0, 1, 1], [], []>} : vector<256x32xf32>, vector<32x32xf32>, vector<256x32xf32> -> vector<256x32xf32>
    %11 = vector.broadcast %9 : vector<1x32xf32> to vector<256x32xf32>
    %12 = arith.addf %10, %11 : vector<256x32xf32>
    %cst_11 = arith.constant 0.000000e+00 : f32
    %13 = vector.broadcast %cst_11 : f32 to vector<256x32xf32>
    %14 = arith.maximumf %12, %13 : vector<256x32xf32>
    %c0_12 = arith.constant 0 : index
    %c0_13 = arith.constant 0 : index
    %15 = vector.load %arg6[%c0_12, %c0_13] : memref<32x32xf32, #tpu.memory_space<vmem>>, vector<32x32xf32>
    %c0_14 = arith.constant 0 : index
    %c0_15 = arith.constant 0 : index
    %16 = vector.load %arg7[%c0_14, %c0_15] : memref<1x32xf32, #tpu.memory_space<vmem>>, vector<1x32xf32>
    %cst_16 = arith.constant dense<0.000000e+00> : vector<256x32xf32>
    %17 = tpu.matmul %14, %15, %cst_16 {dimension_numbers = #tpu.dot_dimension_numbers<[1], [0], [0], [1], [0, 0, 1, 1], [], []>} : vector<256x32xf32>, vector<32x32xf32>, vector<256x32xf32> -> vector<256x32xf32>
    %18 = vector.broadcast %16 : vector<1x32xf32> to vector<256x32xf32>
    %19 = arith.addf %17, %18 : vector<256x32xf32>
    %cst_17 = arith.constant 0.000000e+00 : f32
    %20 = vector.broadcast %cst_17 : f32 to vector<256x32xf32>
    %21 = arith.maximumf %19, %20 : vector<256x32xf32>
    %c0_18 = arith.constant 0 : index
    %c0_19 = arith.constant 0 : index
    %22 = vector.load %arg8[%c0_18, %c0_19] : memref<32x128xf32, #tpu.memory_space<vmem>>, vector<32x128xf32>
    %c0_20 = arith.constant 0 : index
    %c0_21 = arith.constant 0 : index
    %23 = vector.load %arg9[%c0_20, %c0_21] : memref<1x128xf32, #tpu.memory_space<vmem>>, vector<1x128xf32>
    %cst_22 = arith.constant dense<0.000000e+00> : vector<256x128xf32>
    %24 = tpu.matmul %21, %22, %cst_22 {dimension_numbers = #tpu.dot_dimension_numbers<[1], [0], [0], [1], [0, 0, 1, 1], [], []>} : vector<256x32xf32>, vector<32x128xf32>, vector<256x128xf32> -> vector<256x128xf32>
    %25 = vector.broadcast %23 : vector<1x128xf32> to vector<256x128xf32>
    %26 = arith.addf %24, %25 : vector<256x128xf32>
    %c0_23 = arith.constant 0 : index
    %c0_24 = arith.constant 0 : index
    %27 = vector.load %arg10[%c0_23, %c0_24] : memref<256x128xf32, #tpu.memory_space<vmem>>, vector<256x128xf32>
    tpu.vector_store %arg10[%c0_23, %c0_24], %26 {strides = array<i32>} : memref<256x128xf32, #tpu.memory_space<vmem>>, vector<256x128xf32>,
    return
  }
  func.func @transform_0(%arg0: i32) -> (i32, i32) {
    %c0_i32 = arith.constant 0 : i32
    %c0_i32_0 = arith.constant 0 : i32
    return %arg0, %c0_i32 : i32, i32
  }
  func.func @transform_1(%arg0: i32) -> (i32, i32) {
    %c0_i32 = arith.constant 0 : i32
    %c0_i32_0 = arith.constant 0 : i32
    %c0_i32_1 = arith.constant 0 : i32
    return %c0_i32, %c0_i32_0 : i32, i32
  }
  func.func @transform_2(%arg0: i32) -> (i32, i32) {
    %c0_i32 = arith.constant 0 : i32
    %c0_i32_0 = arith.constant 0 : i32
    %c0_i32_1 = arith.constant 0 : i32
    return %c0_i32, %c0_i32_0 : i32, i32
  }
  func.func @transform_3(%arg0: i32) -> (i32, i32) {
    %c0_i32 = arith.constant 0 : i32
    %c0_i32_0 = arith.constant 0 : i32
    %c0_i32_1 = arith.constant 0 : i32
    return %c0_i32, %c0_i32_0 : i32, i32
  }
  func.func @transform_4(%arg0: i32) -> (i32, i32) {
    %c0_i32 = arith.constant 0 : i32
    %c0_i32_0 = arith.constant 0 : i32
    %c0_i32_1 = arith.constant 0 : i32
    return %c0_i32, %c0_i32_0 : i32, i32
  }
  func.func @transform_5(%arg0: i32) -> (i32, i32) {
    %c0_i32 = arith.constant 0 : i32
    %c0_i32_0 = arith.constant 0 : i32
    %c0_i32_1 = arith.constant 0 : i32
    return %c0_i32, %c0_i32_0 : i32, i32
  }
  func.func @transform_6(%arg0: i32) -> (i32, i32) {
    %c0_i32 = arith.constant 0 : i32
    %c0_i32_0 = arith.constant 0 : i32
    %c0_i32_1 = arith.constant 0 : i32
    return %c0_i32, %c0_i32_0 : i32, i32
  }
  func.func @transform_7(%arg0: i32) -> (i32, i32) {
    %c0_i32 = arith.constant 0 : i32
    %c0_i32_0 = arith.constant 0 : i32
    %c0_i32_1 = arith.constant 0 : i32
    return %c0_i32, %c0_i32_0 : i32, i32
  }
  func.func @transform_8(%arg0: i32) -> (i32, i32) {
    %c0_i32 = arith.constant 0 : i32
    %c0_i32_0 = arith.constant 0 : i32
    %c0_i32_1 = arith.constant 0 : i32
    return %c0_i32, %c0_i32_0 : i32, i32
  }
  func.func @transform_9(%arg0: i32) -> (i32, i32) {
    %c0_i32 = arith.constant 0 : i32
    %c0_i32_0 = arith.constant 0 : i32
    return %arg0, %c0_i32 : i32, i32
  }
}

</mosaic_0001>

<bundles_post_ra>
// kernel: tpu_custom_call.1
= control target key start
LH: loop header
LB: loop body
LE: loop exit
PB: predicated region body
PF: predicated region fallthrough
CT: control target
= control target key end

     0   :  { %vm173_vm0 = vcmask 1041408   ;;  %vm76_vm1 = vcmask 211968   ;;  %vm2106_vm2 = vmmov 1   ;;  %s2592_s0 = inlined_call_operand.vmem [shape: f32[256,26], index: 0, kind: input, shape index: {}]   ;;  %s2593_s1 = inlined_call_operand.vmem [shape: f32[26,32], index: 1, kind: input, shape index: {}]   ;;  %s2594_s2 = inlined_call_operand.vmem [shape: f32[1,32], index: 2, kind: input, shape index: {}]   ;;  %s2595_s3 = inlined_call_operand.vmem [shape: f32[32,32], index: 3, kind: input, shape index: {}]   ;;  %s2596_s4 = inlined_call_operand.vmem [shape: f32[1,32], index: 4, kind: input, shape index: {}]   ;;  %s2597_s5 = inlined_call_operand.vmem [shape: f32[32,32], index: 5, kind: input, shape index: {}]   ;;  %s2598_s6 = inlined_call_operand.vmem [shape: f32[1,32], index: 6, kind: input, shape index: {}]   ;;  %s2599_s7 = inlined_call_operand.vmem [shape: f32[32,128], index: 7, kind: input, shape index: {}]   ;;  %s2600_s8 = inlined_call_operand.vmem [shape: f32[1,128], index: 8, kind: input, shape index: {}]   ;;  %s2601_s9 = inlined_call_operand.hbm [shape: f32[256,128], index: 9, kind: output, shape index: {}]  }
   0x1   :  { %v65_v0 = vld [vmem:[%s2593_s1] sm:$0xff]  ;;  %v66_v1 = vld [vmem:[%s2593_s1 + $0x8] sm:$0xff]  ;;  %v67_v2 = vld [vmem:[%s2593_s1 + $0x10] sm:$0xff] }
   0x2   :  { %v2044_v3 = vpack.c.bf16 %v66_v1, %v65_v0  ;;  %v68_v4 = vld [vmem:[%s2593_s1 + $0x18] sm:$0x3]  ;;  %v33_v5 = vld [vmem:[%s2592_s0] sm:$0xff]  ;;  %vm2049_vm3 = vmpackc.low %vm173_vm0, %vm2106_vm2 }
   0x3   :  { %v2048_v6 = vpack.c.bf16 %v68_v4, %v67_v2  ;;  %1828 = vmatprep.mubr.msk.f32.mxu0 %vm76_vm1, %v33_v5  ;;  %v34_v7 = vld [vmem:[%s2592_s0 + $0x8] sm:$0xff]  ;;  %v35_v8 = vld [vmem:[%s2592_s0 + $0x10] sm:$0xff]  ;;  %v36_v9 = vld [vmem:[%s2592_s0 + $0x18] sm:$0xff] }
   0x4   :  { %2045 = vmatprep.subr.bf16.mxu0 %v2044_v3  ;;  %v434_v10 = vld [vmem:[%s2595_s3] sm:$0xff]  ;;  %v435_v11 = vld [vmem:[%s2595_s3 + $0x8] sm:$0xff] }
   0x5   :  { %2047 = vmatpush3.bf16.msra.mxu0 %v2044_v3  ;;  %v37_v12 = vld [vmem:[%s2592_s0 + $0x20] sm:$0xff]  ;;  %v2054_v13 = vpack.c.bf16 %v435_v11, %v434_v10 }
   0x6   :  { %2050 = vmatprep.subr.msk.bf16.mxu0 %vm2049_vm3, %v2048_v6 }
   0x9   :  { %2053 = vmatpush3.bf16.msk.msra.mxu0 %vm2049_vm3, %v2048_v6 }
   0xc   :  { %1829 = vmatmul.mubr.msk.f32.vlgmr.msra.gmra.mrb[0].mxu0 %vm76_vm1, %v34_v7 }
   0xd   :  { %1831 = vmatprep.mubr.msk.f32.mxu0 %vm76_vm1, %v35_v8 }
   0xe   :  { %14 = vsyncpa [#allocation3], 0  ;;  %2055 = vmatprep.subr.bf16.mxu1 %v2054_v13  ;;  %v38_v14 = vld [vmem:[%s2592_s0 + $0x28] sm:$0xff]  ;;  %v39_v15 = vld [vmem:[%s2592_s0 + $0x30] sm:$0xff]  ;;  %vm445_vm4 = vcmask 261120  }
   0xf   :  { %2057 = vmatpush3.bf16.msra.mxu1 %v2054_v13  ;;  %v40_v16 = vld [vmem:[%s2592_s0 + $0x38] sm:$0xff]  ;;  %v41_v17 = vld [vmem:[%s2592_s0 + $0x40] sm:$0xff]  ;;  %v42_v18 = vld [vmem:[%s2592_s0 + $0x48] sm:$0xff] }
  0x10   :  { %1832 = vmatmul.mubr.msk.f32.gmra.mrb[2].mxu0 %vm76_vm1, %v36_v9  ;;  %v43_v19 = vld [vmem:[%s2592_s0 + $0x50] sm:$0xff]  ;;  %v44_v20 = vld [vmem:[%s2592_s0 + $0x58] sm:$0xff]  ;;  %v45_v21 = vld [vmem:[%s2592_s0 + $0x60] sm:$0xff] }
  0x11   :  { %1834 = vmatprep.mubr.msk.f32.mxu0 %vm76_vm1, %v37_v12  ;;  %v46_v22 = vld [vmem:[%s2592_s0 + $0x68] sm:$0xff]  ;;  %v47_v23 = vld [vmem:[%s2592_s0 + $0x70] sm:$0xff]  ;;  %v48_v24 = vld [vmem:[%s2592_s0 + $0x78] sm:$0xff] }
  0x12   :  { %v49_v25 = vld [vmem:[%s2592_s0 + $0x80] sm:$0xff]  ;;  %v50_v26 = vld [vmem:[%s2592_s0 + $0x88] sm:$0xff]  ;;  %v51_v27 = vld [vmem:[%s2592_s0 + $0x90] sm:$0xff] }
  0x13   :  { %v52_v28 = vld [vmem:[%s2592_s0 + $0x98] sm:$0xff]  ;;  %v53_v29 = vld [vmem:[%s2592_s0 + $0xa0] sm:$0xff]  ;;  %v54_v30 = vld [vmem:[%s2592_s0 + $0xa8] sm:$0xff] }
  0x14   :  { %1835 = vmatmul.mubr.msk.f32.gmra.mrb[4].mxu0 %vm76_vm1, %v38_v14  ;;  %v55_v31 = vld [vmem:[%s2592_s0 + $0xb0] sm:$0xff]  ;;  %v56_v32 = vld [vmem:[%s2592_s0 + $0xb8] sm:$0xff]  ;;  %v57_v33 = vld [vmem:[%s2592_s0 + $0xc0] sm:$0xff] }
  0x15   :  { %1837 = vmatprep.mubr.msk.f32.mxu0 %vm76_vm1, %v39_v15  ;;  %v58_v34 = vld [vmem:[%s2592_s0 + $0xc8] sm:$0xff]  ;;  %v59_v35 = vld [vmem:[%s2592_s0 + $0xd0] sm:$0xff]  ;;  %v60_v36 = vld [vmem:[%s2592_s0 + $0xd8] sm:$0xff] }
  0x16   :  { %v61_v37 = vld [vmem:[%s2592_s0 + $0xe0] sm:$0xff]  ;;  %v62_v38 = vld [vmem:[%s2592_s0 + $0xe8] sm:$0xff]  ;;  %v63_v39 = vld [vmem:[%s2592_s0 + $0xf0] sm:$0xff] }
  0x17   :  { %v64_v40 = vld [vmem:[%s2592_s0 + $0xf8] sm:$0xff]  ;;  %v436_v41 = vld [vmem:[%s2595_s3 + $0x10] sm:$0xff]  ;;  %v799_v44 = vld [vmem:[%s2597_s5] sm:$0xff] }
  0x18   :  { %1838 = vmatmul.mubr.msk.f32.gmra.mrb[6].mxu0 %vm76_vm1, %v40_v16  ;;  %v437_v42 = vld [vmem:[%s2595_s3 + $0x18] sm:$0xff]  ;;  %v800_v45 = vld [vmem:[%s2597_s5 + $0x8] sm:$0xff]  ;;  %v801_v46 = vld [vmem:[%s2597_s5 + $0x10] sm:$0xff] }
  0x19   :  { %1840 = vmatprep.mubr.msk.f32.mxu0 %vm76_vm1, %v41_v17  ;;  %v2058_v43 = vpack.c.bf16 %v437_v42, %v436_v41  ;;  %v2062_v47 = vpack.c.bf16 %v800_v45, %v799_v44  ;;  %v802_v48 = vld [vmem:[%s2597_s5 + $0x18] sm:$0xff]  ;;  %v2327_v50 = vld [vmem:[%s2594_s2] ss:$0 sm:$0xff] }
  0x1a   :  { %v2066_v49 = vpack.c.bf16 %v802_v48, %v801_v46 }
  0x1b   :  { %2059 = vmatprep.subr.bf16.mxu1 %v2058_v43  ;;  %2063 = vmatprep.subr.bf16.mxu0 %v2062_v47 }
  0x1c   :  { %1841 = vmatmul.mubr.msk.f32.gmra.mrb[8].mxu0 %vm76_vm1, %v42_v18  ;;  %2061 = vmatpush3.bf16.msra.mxu1 %v2058_v43 }
  0x1d   :  { %1843 = vmatprep.mubr.msk.f32.mxu0 %vm76_vm1, %v43_v19  ;;  %2065 = vmatpush3.bf16.msra.mxu0 %v2062_v47 }
  0x1e   :  { %2067 = vmatprep.subr.bf16.mxu0 %v2066_v49 }
  0x20   :  { %1844 = vmatmul.mubr.msk.f32.gmra.mrb[10].mxu0 %vm76_vm1, %v44_v20 }
  0x21   :  { %1846 = vmatprep.mubr.msk.f32.mxu0 %vm76_vm1, %v45_v21  ;;  %2069 = vmatpush3.bf16.msra.mxu0 %v2066_v49 }
  0x24   :  { %1847 = vmatmul.mubr.msk.f32.gmra.mrb[12].mxu0 %vm76_vm1, %v46_v22 }
  0x25   :  { %1849 = vmatprep.mubr.msk.f32.mxu0 %vm76_vm1, %v47_v23 }
  0x28   :  { %1850 = vmatmul.mubr.msk.f32.gmra.mrb[14].mxu0 %vm76_vm1, %v48_v24 }
  0x29   :  { %1852 = vmatprep.mubr.msk.f32.mxu0 %vm76_vm1, %v49_v25 }
  0x2c   :  { %1853 = vmatmul.mubr.msk.f32.gmra.mrb[16].mxu0 %vm76_vm1, %v50_v26 }
  0x2d   :  { %1855 = vmatprep.mubr.msk.f32.mxu0 %vm76_vm1, %v51_v27 }
  0x30   :  { %1856 = vmatmul.mubr.msk.f32.gmra.mrb[18].mxu0 %vm76_vm1, %v52_v28 }
  0x31   :  { %1858 = vmatprep.mubr.msk.f32.mxu0 %vm76_vm1, %v53_v29 }
  0x34   :  { %1859 = vmatmul.mubr.msk.f32.gmra.mrb[20].mxu0 %vm76_vm1, %v54_v30 }
  0x35   :  { %1861 = vmatprep.mubr.msk.f32.mxu0 %vm76_vm1, %v55_v31 }
  0x38   :  { %1862 = vmatmul.mubr.msk.f32.gmra.mrb[22].mxu0 %vm76_vm1, %v56_v32 }
  0x39   :  { %1864 = vmatprep.mubr.msk.f32.mxu0 %vm76_vm1, %v57_v33 }
  0x3c   :  { %1865 = vmatmul.mubr.msk.f32.gmra.mrb[24].mxu0 %vm76_vm1, %v58_v34 }
  0x3d   :  { %1867 = vmatprep.mubr.msk.f32.mxu0 %vm76_vm1, %v59_v35 }
  0x40   :  { %1868 = vmatmul.mubr.msk.f32.gmra.mrb[26].mxu0 %vm76_vm1, %v60_v36 }
  0x41   :  { %1870 = vmatprep.mubr.msk.f32.mxu0 %vm76_vm1, %v61_v37 }
  0x44   :  { %1871 = vmatmul.mubr.msk.f32.gmra.mrb[28].mxu0 %vm76_vm1, %v62_v38 }
  0x45   :  { %1873 = vmatprep.mubr.msk.f32.mxu0 %vm76_vm1, %v63_v39 }
  0x48   :  { %1874 = vmatmul.mubr.msk.f32.gmra.mrb[30].mxu0 %vm76_vm1, %v64_v40 }
  0xdf   :  { %v1830_v51 = vpop.f32.mrb[0].mxu0 }
  0xe0   :  { %v249_v52 = vadd.f32 %v1830_v51, %v2327_v50  ;;  %v243_v53 = vpop.f32.mrb[1].mxu0 }
  0xe1   :  { %v244_v54 = vadd.f32 %v2327_v50, %v243_v53 }
  0xe2   :  { %v403_v57 = vmax.f32 %v249_v52, 0.0 }
  0xe3   :  { %v402_v55 = vmax.f32 %v244_v54, 0.0  ;;  %v1833_v56 = vpop.f32.mrb[2].mxu0 }
  0xe4   :  { %v259_v58 = vadd.f32 %v1833_v56, %v2327_v50  ;;  %v253_v59 = vpop.f32.mrb[3].mxu0 }
  0xe5   :  { %v254_v60 = vadd.f32 %v2327_v50, %v253_v59  ;;  %1884 = vmatprep.mubr.msk.f32.mxu1 %vm445_vm4, %v402_v55 }
  0xe6   :  { %1885 = vmatmul.mubr.msk.f32.vlgmr.msra.gmra.mrb[0].mxu1 %vm445_vm4, %v403_v57  ;;  %v405_v63 = vmax.f32 %v259_v58, 0.0 }
  0xe7   :  { %v404_v61 = vmax.f32 %v254_v60, 0.0  ;;  %v1836_v62 = vpop.f32.mrb[4].mxu0 }
  0xe8   :  { %v269_v0 = vadd.f32 %v1836_v62, %v2327_v50  ;;  %v263_v1 = vpop.f32.mrb[5].mxu0 }
  0xe9   :  { %v264_v2 = vadd.f32 %v2327_v50, %v263_v1  ;;  %1887 = vmatprep.mubr.msk.f32.mxu1 %vm445_vm4, %v404_v61 }
  0xea   :  { %1888 = vmatmul.mubr.msk.f32.gmra.mrb[2].mxu1 %vm445_vm4, %v405_v63  ;;  %v407_v5 = vmax.f32 %v269_v0, 0.0 }
  0xeb   :  { %v406_v3 = vmax.f32 %v264_v2, 0.0  ;;  %v1839_v4 = vpop.f32.mrb[6].mxu0 }
  0xec   :  { %v279_v6 = vadd.f32 %v1839_v4, %v2327_v50  ;;  %v273_v7 = vpop.f32.mrb[7].mxu0 }
  0xed   :  { %v274_v8 = vadd.f32 %v2327_v50, %v273_v7  ;;  %1890 = vmatprep.mubr.msk.f32.mxu1 %vm445_vm4, %v406_v3 }
  0xee   :  { %1891 = vmatmul.mubr.msk.f32.gmra.mrb[4].mxu1 %vm445_vm4, %v407_v5  ;;  %v409_v11 = vmax.f32 %v279_v6, 0.0 }
  0xef   :  { %v408_v9 = vmax.f32 %v274_v8, 0.0  ;;  %v1842_v10 = vpop.f32.mrb[8].mxu0 }
  0xf0   :  { %v289_v12 = vadd.f32 %v1842_v10, %v2327_v50  ;;  %v283_v13 = vpop.f32.mrb[9].mxu0 }
  0xf1   :  { %v284_v14 = vadd.f32 %v2327_v50, %v283_v13  ;;  %1893 = vmatprep.mubr.msk.f32.mxu1 %vm445_vm4, %v408_v9 }
  0xf2   :  { %1894 = vmatmul.mubr.msk.f32.gmra.mrb[6].mxu1 %vm445_vm4, %v409_v11  ;;  %v411_v17 = vmax.f32 %v289_v12, 0.0 }
  0xf3   :  { %v410_v15 = vmax.f32 %v284_v14, 0.0  ;;  %v1845_v16 = vpop.f32.mrb[10].mxu0 }
  0xf4   :  { %v299_v18 = vadd.f32 %v1845_v16, %v2327_v50  ;;  %v293_v19 = vpop.f32.mrb[11].mxu0 }
  0xf5   :  { %v294_v20 = vadd.f32 %v2327_v50, %v293_v19  ;;  %1896 = vmatprep.mubr.msk.f32.mxu1 %vm445_vm4, %v410_v15 }
  0xf6   :  { %1897 = vmatmul.mubr.msk.f32.gmra.mrb[8].mxu1 %vm445_vm4, %v411_v17  ;;  %v413_v23 = vmax.f32 %v299_v18, 0.0 }
  0xf7   :  { %v412_v21 = vmax.f32 %v294_v20, 0.0  ;;  %v1848_v22 = vpop.f32.mrb[12].mxu0  ;;  %v1163_v20 = vld [vmem:[%s2599_s7] sm:$0xff] }
  0xf8   :  { %v309_v24 = vadd.f32 %v1848_v22, %v2327_v50  ;;  %v303_v25 = vpop.f32.mrb[13].mxu0 }
  0xf9   :  { %v304_v26 = vadd.f32 %v2327_v50, %v303_v25  ;;  %1899 = vmatprep.mubr.msk.f32.mxu1 %vm445_vm4, %v412_v21  ;;  %v1164_v21 = vld [vmem:[%s2599_s7 + $0x8] sm:$0xff]  ;;  %v2408_v25 = vld [vmem:[%s2596_s4] ss:$0 sm:$0xff] }
  0xfa   :  { %1900 = vmatmul.mubr.msk.f32.gmra.mrb[10].mxu1 %vm445_vm4, %v413_v23  ;;  %v415_v29 = vmax.f32 %v309_v24, 0.0  ;;  %v2070_v22 = vpack.c.bf16 %v1164_v21, %v1163_v20  ;;  %v1166_v23 = vld [vmem:[%s2599_s7 + $0x18] sm:$0xff] }
  0xfb   :  { %v414_v27 = vmax.f32 %v304_v26, 0.0  ;;  %v1851_v28 = vpop.f32.mrb[14].mxu0 }
  0xfc   :  { %v319_v30 = vadd.f32 %v1851_v28, %v2327_v50  ;;  %v313_v31 = vpop.f32.mrb[15].mxu0  ;;  %2071 = vmatprep.subr.bf16.mxu1 %v2070_v22 }
  0xfd   :  { %v314_v32 = vadd.f32 %v2327_v50, %v313_v31  ;;  %1902 = vmatprep.mubr.msk.f32.mxu1 %vm445_vm4, %v414_v27  ;;  %2073 = vmatpush3.bf16.msra.mxu1 %v2070_v22 }
  0xfe   :  { %1903 = vmatmul.mubr.msk.f32.gmra.mrb[12].mxu1 %vm445_vm4, %v415_v29  ;;  %v417_v35 = vmax.f32 %v319_v30, 0.0 }
  0xff   :  { %v416_v33 = vmax.f32 %v314_v32, 0.0  ;;  %v1854_v34 = vpop.f32.mrb[16].mxu0 }
 0x100   :  { %v329_v36 = vadd.f32 %v1854_v34, %v2327_v50  ;;  %v323_v37 = vpop.f32.mrb[17].mxu0 }
 0x101   :  { %v324_v38 = vadd.f32 %v2327_v50, %v323_v37  ;;  %1905 = vmatprep.mubr.msk.f32.mxu1 %vm445_vm4, %v416_v33 }
 0x102   :  { %1906 = vmatmul.mubr.msk.f32.gmra.mrb[14].mxu1 %vm445_vm4, %v417_v35  ;;  %v419_v41 = vmax.f32 %v329_v36, 0.0 }
 0x103   :  { %v418_v39 = vmax.f32 %v324_v38, 0.0  ;;  %v1857_v40 = vpop.f32.mrb[18].mxu0 }
 0x104   :  { %v339_v42 = vadd.f32 %v1857_v40, %v2327_v50  ;;  %v333_v43 = vpop.f32.mrb[19].mxu0 }
 0x105   :  { %v334_v44 = vadd.f32 %v2327_v50, %v333_v43  ;;  %1908 = vmatprep.mubr.msk.f32.mxu1 %vm445_vm4, %v418_v39 }
 0x106   :  { %1909 = vmatmul.mubr.msk.f32.gmra.mrb[16].mxu1 %vm445_vm4, %v419_v41  ;;  %v421_v47 = vmax.f32 %v339_v42, 0.0 }
 0x107   :  { %v420_v45 = vmax.f32 %v334_v44, 0.0  ;;  %v1860_v46 = vpop.f32.mrb[20].mxu0 }
 0x108   :  { %v349_v48 = vadd.f32 %v1860_v46, %v2327_v50  ;;  %v343_v49 = vpop.f32.mrb[21].mxu0 }
 0x109   :  { %v344_v51 = vadd.f32 %v2327_v50, %v343_v49  ;;  %1911 = vmatprep.mubr.msk.f32.mxu1 %vm445_vm4, %v420_v45 }
 0x10a   :  { %1912 = vmatmul.mubr.msk.f32.gmra.mrb[18].mxu1 %vm445_vm4, %v421_v47  ;;  %v423_v54 = vmax.f32 %v349_v48, 0.0 }
 0x10b   :  { %v422_v52 = vmax.f32 %v344_v51, 0.0  ;;  %v1863_v53 = vpop.f32.mrb[22].mxu0 }
 0x10c   :  { %v359_v55 = vadd.f32 %v1863_v53, %v2327_v50  ;;  %v353_v56 = vpop.f32.mrb[23].mxu0 }
 0x10d   :  { %v354_v57 = vadd.f32 %v2327_v50, %v353_v56  ;;  %1914 = vmatprep.mubr.msk.f32.mxu1 %vm445_vm4, %v422_v52 }
 0x10e   :  { %1915 = vmatmul.mubr.msk.f32.gmra.mrb[20].mxu1 %vm445_vm4, %v423_v54  ;;  %v425_v60 = vmax.f32 %v359_v55, 0.0 }
 0x10f   :  { %v424_v58 = vmax.f32 %v354_v57, 0.0  ;;  %v1866_v59 = vpop.f32.mrb[24].mxu0 }
 0x110   :  { %v369_v61 = vadd.f32 %v1866_v59, %v2327_v50  ;;  %v363_v62 = vpop.f32.mrb[25].mxu0 }
 0x111   :  { %v364_v63 = vadd.f32 %v2327_v50, %v363_v62  ;;  %1917 = vmatprep.mubr.msk.f32.mxu1 %vm445_vm4, %v424_v58 }
 0x112   :  { %1918 = vmatmul.mubr.msk.f32.gmra.mrb[22].mxu1 %vm445_vm4, %v425_v60  ;;  %v427_v2 = vmax.f32 %v369_v61, 0.0 }
 0x113   :  { %v426_v0 = vmax.f32 %v364_v63, 0.0  ;;  %v1869_v1 = vpop.f32.mrb[26].mxu0 }
 0x114   :  { %v379_v3 = vadd.f32 %v1869_v1, %v2327_v50  ;;  %v373_v4 = vpop.f32.mrb[27].mxu0 }
 0x115   :  { %v374_v5 = vadd.f32 %v2327_v50, %v373_v4  ;;  %1920 = vmatprep.mubr.msk.f32.mxu1 %vm445_vm4, %v426_v0 }
 0x116   :  { %1921 = vmatmul.mubr.msk.f32.gmra.mrb[24].mxu1 %vm445_vm4, %v427_v2  ;;  %v429_v8 = vmax.f32 %v379_v3, 0.0 }
 0x117   :  { %v428_v6 = vmax.f32 %v374_v5, 0.0  ;;  %v1872_v7 = vpop.f32.mrb[28].mxu0 }
 0x118   :  { %v389_v9 = vadd.f32 %v1872_v7, %v2327_v50  ;;  %v383_v10 = vpop.f32.mrb[29].mxu0 }
 0x119   :  { %v384_v11 = vadd.f32 %v2327_v50, %v383_v10  ;;  %1923 = vmatprep.mubr.msk.f32.mxu1 %vm445_vm4, %v428_v6 }
 0x11a   :  { %1924 = vmatmul.mubr.msk.f32.gmra.mrb[26].mxu1 %vm445_vm4, %v429_v8  ;;  %v431_v14 = vmax.f32 %v389_v9, 0.0 }
 0x11b   :  { %v430_v12 = vmax.f32 %v384_v11, 0.0  ;;  %v1875_v13 = vpop.f32.mrb[30].mxu0 }
 0x11c   :  { %v399_v15 = vadd.f32 %v1875_v13, %v2327_v50  ;;  %v393_v16 = vpop.f32.mrb[31].mxu0 }
 0x11d   :  { %v394_v17 = vadd.f32 %v2327_v50, %v393_v16  ;;  %1926 = vmatprep.mubr.msk.f32.mxu1 %vm445_vm4, %v430_v12  ;;  %v1165_v50 = vld [vmem:[%s2599_s7 + $0x10] sm:$0xff] }
 0x11e   :  { %1927 = vmatmul.mubr.msk.f32.gmra.mrb[28].mxu1 %vm445_vm4, %v431_v14  ;;  %v433_v19 = vmax.f32 %v399_v15, 0.0  ;;  %v2074_v24 = vpack.c.bf16 %v1166_v23, %v1165_v50 }
 0x11f   :  { %v432_v18 = vmax.f32 %v394_v17, 0.0 }
 0x120   :  { %2075 = vmatprep.subr.bf16.mxu1 %v2074_v24 }
 0x121   :  { %1929 = vmatprep.mubr.msk.f32.mxu1 %vm445_vm4, %v432_v18  ;;  %2077 = vmatpush3.bf16.msra.mxu1 %v2074_v24 }
 0x122   :  { %1930 = vmatmul.mubr.msk.f32.gmra.mrb[30].mxu1 %vm445_vm4, %v433_v19 }
 0x1b9   :  { %v1886_v26 = vpop.f32.mrb[0].mxu1 }
 0x1ba   :  { %v614_v27 = vadd.f32 %v1886_v26, %v2408_v25  ;;  %v608_v28 = vpop.f32.mrb[1].mxu1 }
 0x1bb   :  { %v609_v29 = vadd.f32 %v2408_v25, %v608_v28 }
 0x1bc   :  { %v768_v32 = vmax.f32 %v614_v27, 0.0 }
 0x1bd   :  { %v767_v30 = vmax.f32 %v609_v29, 0.0  ;;  %v1889_v31 = vpop.f32.mrb[2].mxu1 }
 0x1be   :  { %v624_v33 = vadd.f32 %v1889_v31, %v2408_v25  ;;  %v618_v34 = vpop.f32.mrb[3].mxu1 }
 0x1bf   :  { %v619_v35 = vadd.f32 %v2408_v25, %v618_v34  ;;  %1940 = vmatprep.mubr.msk.f32.mxu0 %vm445_vm4, %v767_v30 }
 0x1c0   :  { %1941 = vmatmul.mubr.msk.f32.vlgmr.msra.gmra.mrb[32].mxu0 %vm445_vm4, %v768_v32  ;;  %v770_v38 = vmax.f32 %v624_v33, 0.0 }
 0x1c1   :  { %v769_v36 = vmax.f32 %v619_v35, 0.0  ;;  %v1892_v37 = vpop.f32.mrb[4].mxu1 }
 0x1c2   :  { %v634_v39 = vadd.f32 %v1892_v37, %v2408_v25  ;;  %v628_v40 = vpop.f32.mrb[5].mxu1 }
 0x1c3   :  { %v629_v41 = vadd.f32 %v2408_v25, %v628_v40  ;;  %1943 = vmatprep.mubr.msk.f32.mxu0 %vm445_vm4, %v769_v36 }
 0x1c4   :  { %1944 = vmatmul.mubr.msk.f32.gmra.mrb[34].mxu0 %vm445_vm4, %v770_v38  ;;  %v772_v44 = vmax.f32 %v634_v39, 0.0 }
 0x1c5   :  { %v771_v42 = vmax.f32 %v629_v41, 0.0  ;;  %v1895_v43 = vpop.f32.mrb[6].mxu1 }
 0x1c6   :  { %v644_v45 = vadd.f32 %v1895_v43, %v2408_v25  ;;  %v638_v46 = vpop.f32.mrb[7].mxu1 }
 0x1c7   :  { %v639_v47 = vadd.f32 %v2408_v25, %v638_v46  ;;  %1946 = vmatprep.mubr.msk.f32.mxu0 %vm445_vm4, %v771_v42 }
 0x1c8   :  { %1947 = vmatmul.mubr.msk.f32.gmra.mrb[36].mxu0 %vm445_vm4, %v772_v44  ;;  %v774_v51 = vmax.f32 %v644_v45, 0.0 }
 0x1c9   :  { %v773_v48 = vmax.f32 %v639_v47, 0.0  ;;  %v1898_v49 = vpop.f32.mrb[8].mxu1 }
 0x1ca   :  { %v654_v52 = vadd.f32 %v1898_v49, %v2408_v25  ;;  %v648_v53 = vpop.f32.mrb[9].mxu1 }
 0x1cb   :  { %v649_v54 = vadd.f32 %v2408_v25, %v648_v53  ;;  %1949 = vmatprep.mubr.msk.f32.mxu0 %vm445_vm4, %v773_v48 }
 0x1cc   :  { %1950 = vmatmul.mubr.msk.f32.gmra.mrb[38].mxu0 %vm445_vm4, %v774_v51  ;;  %v776_v57 = vmax.f32 %v654_v52, 0.0 }
 0x1cd   :  { %v775_v55 = vmax.f32 %v649_v54, 0.0  ;;  %v1901_v56 = vpop.f32.mrb[10].mxu1 }
 0x1ce   :  { %v664_v58 = vadd.f32 %v1901_v56, %v2408_v25  ;;  %v658_v59 = vpop.f32.mrb[11].mxu1 }
 0x1cf   :  { %v659_v60 = vadd.f32 %v2408_v25, %v658_v59  ;;  %1952 = vmatprep.mubr.msk.f32.mxu0 %vm445_vm4, %v775_v55 }
 0x1d0   :  { %1953 = vmatmul.mubr.msk.f32.gmra.mrb[40].mxu0 %vm445_vm4, %v776_v57  ;;  %v778_v63 = vmax.f32 %v664_v58, 0.0 }
 0x1d1   :  { %v777_v61 = vmax.f32 %v659_v60, 0.0  ;;  %v1904_v62 = vpop.f32.mrb[12].mxu1  ;;  %v2477_v60 = vld [vmem:[%s2598_s6] ss:$0 sm:$0xff] }
 0x1d2   :  { %v674_v0 = vadd.f32 %v1904_v62, %v2408_v25  ;;  %v668_v1 = vpop.f32.mrb[13].mxu1 }
 0x1d3   :  { %v669_v2 = vadd.f32 %v2408_v25, %v668_v1  ;;  %1955 = vmatprep.mubr.msk.f32.mxu0 %vm445_vm4, %v777_v61 }
 0x1d4   :  { %1956 = vmatmul.mubr.msk.f32.gmra.mrb[42].mxu0 %vm445_vm4, %v778_v63  ;;  %v780_v5 = vmax.f32 %v674_v0, 0.0 }
 0x1d5   :  { %v779_v3 = vmax.f32 %v669_v2, 0.0  ;;  %v1907_v4 = vpop.f32.mrb[14].mxu1 }
 0x1d6   :  { %v684_v6 = vadd.f32 %v1907_v4, %v2408_v25  ;;  %v678_v7 = vpop.f32.mrb[15].mxu1 }
 0x1d7   :  { %v679_v8 = vadd.f32 %v2408_v25, %v678_v7  ;;  %1958 = vmatprep.mubr.msk.f32.mxu0 %vm445_vm4, %v779_v3 }
 0x1d8   :  { %1959 = vmatmul.mubr.msk.f32.gmra.mrb[44].mxu0 %vm445_vm4, %v780_v5  ;;  %v782_v11 = vmax.f32 %v684_v6, 0.0 }
 0x1d9   :  { %v781_v9 = vmax.f32 %v679_v8, 0.0  ;;  %v1910_v10 = vpop.f32.mrb[16].mxu1 }
 0x1da   :  { %v694_v12 = vadd.f32 %v1910_v10, %v2408_v25  ;;  %v688_v13 = vpop.f32.mrb[17].mxu1 }
 0x1db   :  { %v689_v14 = vadd.f32 %v2408_v25, %v688_v13  ;;  %1961 = vmatprep.mubr.msk.f32.mxu0 %vm445_vm4, %v781_v9 }
 0x1dc   :  { %1962 = vmatmul.mubr.msk.f32.gmra.mrb[46].mxu0 %vm445_vm4, %v782_v11  ;;  %v784_v17 = vmax.f32 %v694_v12, 0.0 }
 0x1dd   :  { %v783_v15 = vmax.f32 %v689_v14, 0.0  ;;  %v1913_v16 = vpop.f32.mrb[18].mxu1 }
 0x1de   :  { %v704_v18 = vadd.f32 %v1913_v16, %v2408_v25  ;;  %v698_v19 = vpop.f32.mrb[19].mxu1 }
 0x1df   :  { %v699_v20 = vadd.f32 %v2408_v25, %v698_v19  ;;  %1964 = vmatprep.mubr.msk.f32.mxu0 %vm445_vm4, %v783_v15 }
 0x1e0   :  { %1965 = vmatmul.mubr.msk.f32.gmra.mrb[48].mxu0 %vm445_vm4, %v784_v17  ;;  %v786_v22 = vmax.f32 %v704_v18, 0.0 }
 0x1e1   :  { %v785_v21 = vmax.f32 %v699_v20, 0.0  ;;  %v1916_v50 = vpop.f32.mrb[20].mxu1 }
 0x1e2   :  { %v714_v23 = vadd.f32 %v1916_v50, %v2408_v25  ;;  %v708_v24 = vpop.f32.mrb[21].mxu1 }
 0x1e3   :  { %v709_v26 = vadd.f32 %v2408_v25, %v708_v24  ;;  %1967 = vmatprep.mubr.msk.f32.mxu0 %vm445_vm4, %v785_v21 }
 0x1e4   :  { %1968 = vmatmul.mubr.msk.f32.gmra.mrb[50].mxu0 %vm445_vm4, %v786_v22  ;;  %v788_v29 = vmax.f32 %v714_v23, 0.0 }
 0x1e5   :  { %v787_v27 = vmax.f32 %v709_v26, 0.0  ;;  %v1919_v28 = vpop.f32.mrb[22].mxu1 }
 0x1e6   :  { %v724_v30 = vadd.f32 %v1919_v28, %v2408_v25  ;;  %v718_v31 = vpop.f32.mrb[23].mxu1 }
 0x1e7   :  { %v719_v32 = vadd.f32 %v2408_v25, %v718_v31  ;;  %1970 = vmatprep.mubr.msk.f32.mxu0 %vm445_vm4, %v787_v27 }
 0x1e8   :  { %1971 = vmatmul.mubr.msk.f32.gmra.mrb[52].mxu0 %vm445_vm4, %v788_v29  ;;  %v790_v35 = vmax.f32 %v724_v30, 0.0 }
 0x1e9   :  { %v789_v33 = vmax.f32 %v719_v32, 0.0  ;;  %v1922_v34 = vpop.f32.mrb[24].mxu1 }
 0x1ea   :  { %v734_v36 = vadd.f32 %v1922_v34, %v2408_v25  ;;  %v728_v37 = vpop.f32.mrb[25].mxu1 }
 0x1eb   :  { %v729_v38 = vadd.f32 %v2408_v25, %v728_v37  ;;  %1973 = vmatprep.mubr.msk.f32.mxu0 %vm445_vm4, %v789_v33 }
 0x1ec   :  { %1974 = vmatmul.mubr.msk.f32.gmra.mrb[54].mxu0 %vm445_vm4, %v790_v35  ;;  %v792_v41 = vmax.f32 %v734_v36, 0.0 }
 0x1ed   :  { %v791_v39 = vmax.f32 %v729_v38, 0.0  ;;  %v1925_v40 = vpop.f32.mrb[26].mxu1 }
 0x1ee   :  { %v744_v42 = vadd.f32 %v1925_v40, %v2408_v25  ;;  %v738_v43 = vpop.f32.mrb[27].mxu1 }
 0x1ef   :  { %v739_v44 = vadd.f32 %v2408_v25, %v738_v43  ;;  %1976 = vmatprep.mubr.msk.f32.mxu0 %vm445_vm4, %v791_v39 }
 0x1f0   :  { %1977 = vmatmul.mubr.msk.f32.gmra.mrb[56].mxu0 %vm445_vm4, %v792_v41  ;;  %v794_v47 = vmax.f32 %v744_v42, 0.0 }
 0x1f1   :  { %v793_v45 = vmax.f32 %v739_v44, 0.0  ;;  %v1928_v46 = vpop.f32.mrb[28].mxu1 }
 0x1f2   :  { %v754_v48 = vadd.f32 %v1928_v46, %v2408_v25  ;;  %v748_v49 = vpop.f32.mrb[29].mxu1 }
 0x1f3   :  { %v749_v51 = vadd.f32 %v2408_v25, %v748_v49  ;;  %1979 = vmatprep.mubr.msk.f32.mxu0 %vm445_vm4, %v793_v45 }
 0x1f4   :  { %1980 = vmatmul.mubr.msk.f32.gmra.mrb[58].mxu0 %vm445_vm4, %v794_v47  ;;  %v796_v54 = vmax.f32 %v754_v48, 0.0 }
 0x1f5   :  { %v795_v52 = vmax.f32 %v749_v51, 0.0  ;;  %v1931_v53 = vpop.f32.mrb[30].mxu1 }
 0x1f6   :  { %v764_v55 = vadd.f32 %v1931_v53, %v2408_v25  ;;  %v758_v56 = vpop.f32.mrb[31].mxu1 }
 0x1f7   :  { %v759_v57 = vadd.f32 %v2408_v25, %v758_v56  ;;  %1982 = vmatprep.mubr.msk.f32.mxu0 %vm445_vm4, %v795_v52 }
 0x1f8   :  { %1983 = vmatmul.mubr.msk.f32.gmra.mrb[60].mxu0 %vm445_vm4, %v796_v54  ;;  %v798_v59 = vmax.f32 %v764_v55, 0.0 }
 0x1f9   :  { %v797_v58 = vmax.f32 %v759_v57, 0.0 }
 0x1fb   :  { %1985 = vmatprep.mubr.msk.f32.mxu0 %vm445_vm4, %v797_v58 }
 0x1fc   :  { %1986 = vmatmul.mubr.msk.f32.gmra.mrb[62].mxu0 %vm445_vm4, %v798_v59 }
 0x293   :  { %v1942_v61 = vpop.f32.mrb[32].mxu0 }
 0x294   :  { %v978_v62 = vadd.f32 %v1942_v61, %v2477_v60  ;;  %v972_v63 = vpop.f32.mrb[33].mxu0 }
 0x295   :  { %v973_v25 = vadd.f32 %v2477_v60, %v972_v63 }
 0x296   :  { %v1132_v2 = vmax.f32 %v978_v62, 0.0 }
 0x297   :  { %v1131_v0 = vmax.f32 %v973_v25, 0.0  ;;  %v1945_v1 = vpop.f32.mrb[34].mxu0 }
 0x298   :  { %v988_v3 = vadd.f32 %v1945_v1, %v2477_v60  ;;  %v982_v4 = vpop.f32.mrb[35].mxu0 }
 0x299   :  { %v983_v5 = vadd.f32 %v2477_v60, %v982_v4  ;;  %1996 = vmatprep.mubr.msk.f32.mxu1 %vm445_vm4, %v1131_v0 }
 0x29a   :  { %1997 = vmatmul.mubr.msk.f32.vlgmr.msra.gmra.mrb[32].mxu1 %vm445_vm4, %v1132_v2  ;;  %v1134_v8 = vmax.f32 %v988_v3, 0.0 }
 0x29b   :  { %v1133_v6 = vmax.f32 %v983_v5, 0.0  ;;  %v1948_v7 = vpop.f32.mrb[36].mxu0 }
 0x29c   :  { %v998_v9 = vadd.f32 %v1948_v7, %v2477_v60  ;;  %v992_v10 = vpop.f32.mrb[37].mxu0 }
 0x29d   :  { %v993_v11 = vadd.f32 %v2477_v60, %v992_v10  ;;  %1999 = vmatprep.mubr.msk.f32.mxu1 %vm445_vm4, %v1133_v6 }
 0x29e   :  { %2000 = vmatmul.mubr.msk.f32.gmra.mrb[34].mxu1 %vm445_vm4, %v1134_v8  ;;  %v1136_v14 = vmax.f32 %v998_v9, 0.0 }
 0x29f   :  { %v1135_v12 = vmax.f32 %v993_v11, 0.0  ;;  %v1951_v13 = vpop.f32.mrb[38].mxu0 }
 0x2a0   :  { %v1008_v15 = vadd.f32 %v1951_v13, %v2477_v60  ;;  %v1002_v16 = vpop.f32.mrb[39].mxu0 }
 0x2a1   :  { %v1003_v17 = vadd.f32 %v2477_v60, %v1002_v16  ;;  %2002 = vmatprep.mubr.msk.f32.mxu1 %vm445_vm4, %v1135_v12 }
 0x2a2   :  { %2003 = vmatmul.mubr.msk.f32.gmra.mrb[36].mxu1 %vm445_vm4, %v1136_v14  ;;  %v1138_v20 = vmax.f32 %v1008_v15, 0.0 }
 0x2a3   :  { %v1137_v18 = vmax.f32 %v1003_v17, 0.0  ;;  %v1954_v19 = vpop.f32.mrb[40].mxu0 }
 0x2a4   :  { %v1018_v21 = vadd.f32 %v1954_v19, %v2477_v60  ;;  %v1012_v50 = vpop.f32.mrb[41].mxu0 }
 0x2a5   :  { %v1013_v22 = vadd.f32 %v2477_v60, %v1012_v50  ;;  %2005 = vmatprep.mubr.msk.f32.mxu1 %vm445_vm4, %v1137_v18 }
 0x2a6   :  { %2006 = vmatmul.mubr.msk.f32.gmra.mrb[38].mxu1 %vm445_vm4, %v1138_v20  ;;  %v1140_v26 = vmax.f32 %v1018_v21, 0.0 }
 0x2a7   :  { %v1139_v23 = vmax.f32 %v1013_v22, 0.0  ;;  %v1957_v24 = vpop.f32.mrb[42].mxu0 }
 0x2a8   :  { %v1028_v27 = vadd.f32 %v1957_v24, %v2477_v60  ;;  %v1022_v28 = vpop.f32.mrb[43].mxu0 }
 0x2a9   :  { %v1023_v29 = vadd.f32 %v2477_v60, %v1022_v28  ;;  %2008 = vmatprep.mubr.msk.f32.mxu1 %vm445_vm4, %v1139_v23 }
 0x2aa   :  { %2009 = vmatmul.mubr.msk.f32.gmra.mrb[40].mxu1 %vm445_vm4, %v1140_v26  ;;  %v1142_v32 = vmax.f32 %v1028_v27, 0.0 }
 0x2ab   :  { %v1141_v30 = vmax.f32 %v1023_v29, 0.0  ;;  %v1960_v31 = vpop.f32.mrb[44].mxu0  ;;  %v2546_v29 = vld [vmem:[%s2600_s8] ss:$0 sm:$0xff]  ;;  %s2107_s8 = smov [#allocation2]  }
 0x2ac   :  { %v1038_v33 = vadd.f32 %v1960_v31, %v2477_v60  ;;  %v1032_v34 = vpop.f32.mrb[45].mxu0  ;;  %s1532_s18 = sshll.u32 %s2107_s8, 4  ;;  %s1533_s18 = int_to_ptr.vmem [resolvable:$true] %s1532_s18 }
 0x2ad   :  { %v1033_v35 = vadd.f32 %v2477_v60, %v1032_v34  ;;  %2011 = vmatprep.mubr.msk.f32.mxu1 %vm445_vm4, %v1141_v30  ;;  %s2082_s19 = scalar_lea.vmem %s1533_s18, 4096  ;;  %p2087_p1 = scmp.lt.s32.totalorder %s1533_s18, %s1533_s18 }
 0x2ae   :  { %2012 = vmatmul.mubr.msk.f32.gmra.mrb[42].mxu1 %vm445_vm4, %v1142_v32  ;;  %v1144_v38 = vmax.f32 %v1038_v33, 0.0  ;;  %p2083_p0 = scmp.ne.s32.totalorder %s1533_s18, %s2082_s19  ;;  %p2088_p2 = scmp.lt.s32.totalorder %s2082_s19, %s2082_s19 }
 0x2af   :  { %v1143_v36 = vmax.f32 %v1033_v35, 0.0  ;;  %v1963_v37 = vpop.f32.mrb[46].mxu0 }
 0x2b0   :  { %v1048_v39 = vadd.f32 %v1963_v37, %v2477_v60  ;;  %v1042_v40 = vpop.f32.mrb[47].mxu0  ;;  %p2089_p3 = por %p2088_p2, %p2087_p1 }
 0x2b1   :  { %v1043_v41 = vadd.f32 %v2477_v60, %v1042_v40  ;;  %2014 = vmatprep.mubr.msk.f32.mxu1 %vm445_vm4, %v1143_v36 }
 0x2b2   :  { %2015 = vmatmul.mubr.msk.f32.gmra.mrb[44].mxu1 %vm445_vm4, %v1144_v38  ;;  %v1146_v44 = vmax.f32 %v1048_v39, 0.0  ;;  %p2090_p4 = pnand %p2089_p3, %p2083_p0 }
 0x2b3   :  { %v1145_v42 = vmax.f32 %v1043_v41, 0.0  ;;  %v1966_v43 = vpop.f32.mrb[48].mxu0 }
 0x2b4   :  { %v1058_v45 = vadd.f32 %v1966_v43, %v2477_v60  ;;  %v1052_v46 = vpop.f32.mrb[49].mxu0 }
 0x2b5   :  { %v1053_v47 = vadd.f32 %v2477_v60, %v1052_v46  ;;  %2017 = vmatprep.mubr.msk.f32.mxu1 %vm445_vm4, %v1145_v42 }
 0x2b6   :  { %2018 = vmatmul.mubr.msk.f32.gmra.mrb[46].mxu1 %vm445_vm4, %v1146_v44  ;;  %v1148_v51 = vmax.f32 %v1058_v45, 0.0 }
 0x2b7   :  { %v1147_v48 = vmax.f32 %v1053_v47, 0.0  ;;  %v1969_v49 = vpop.f32.mrb[50].mxu0 }
 0x2b8   :  { %v1068_v52 = vadd.f32 %v1969_v49, %v2477_v60  ;;  %v1062_v53 = vpop.f32.mrb[51].mxu0 }
 0x2b9   :  { %v1063_v54 = vadd.f32 %v2477_v60, %v1062_v53  ;;  %2020 = vmatprep.mubr.msk.f32.mxu1 %vm445_vm4, %v1147_v48 }
 0x2ba   :  { %2021 = vmatmul.mubr.msk.f32.gmra.mrb[48].mxu1 %vm445_vm4, %v1148_v51  ;;  %v1150_v57 = vmax.f32 %v1068_v52, 0.0 }
 0x2bb   :  { %v1149_v55 = vmax.f32 %v1063_v54, 0.0  ;;  %v1972_v56 = vpop.f32.mrb[52].mxu0 }
 0x2bc   :  { %v1078_v58 = vadd.f32 %v1972_v56, %v2477_v60  ;;  %v1072_v59 = vpop.f32.mrb[53].mxu0 }
 0x2bd   :  { %v1073_v61 = vadd.f32 %v2477_v60, %v1072_v59  ;;  %2023 = vmatprep.mubr.msk.f32.mxu1 %vm445_vm4, %v1149_v55 }
 0x2be   :  { %2024 = vmatmul.mubr.msk.f32.gmra.mrb[50].mxu1 %vm445_vm4, %v1150_v57  ;;  %v1152_v25 = vmax.f32 %v1078_v58, 0.0 }
 0x2bf   :  { %v1151_v62 = vmax.f32 %v1073_v61, 0.0  ;;  %v1975_v63 = vpop.f32.mrb[54].mxu0 }
 0x2c0   :  { %v1088_v0 = vadd.f32 %v1975_v63, %v2477_v60  ;;  %v1082_v1 = vpop.f32.mrb[55].mxu0 }
 0x2c1   :  { %v1083_v2 = vadd.f32 %v2477_v60, %v1082_v1  ;;  %2026 = vmatprep.mubr.msk.f32.mxu1 %vm445_vm4, %v1151_v62 }
 0x2c2   :  { %2027 = vmatmul.mubr.msk.f32.gmra.mrb[52].mxu1 %vm445_vm4, %v1152_v25  ;;  %v1154_v5 = vmax.f32 %v1088_v0, 0.0 }
 0x2c3   :  { %v1153_v3 = vmax.f32 %v1083_v2, 0.0  ;;  %v1978_v4 = vpop.f32.mrb[56].mxu0 }
 0x2c4   :  { %v1098_v6 = vadd.f32 %v1978_v4, %v2477_v60  ;;  %v1092_v7 = vpop.f32.mrb[57].mxu0 }
 0x2c5   :  { %v1093_v8 = vadd.f32 %v2477_v60, %v1092_v7  ;;  %2029 = vmatprep.mubr.msk.f32.mxu1 %vm445_vm4, %v1153_v3 }
 0x2c6   :  { %2030 = vmatmul.mubr.msk.f32.gmra.mrb[54].mxu1 %vm445_vm4, %v1154_v5  ;;  %v1156_v11 = vmax.f32 %v1098_v6, 0.0 }
 0x2c7   :  { %v1155_v9 = vmax.f32 %v1093_v8, 0.0  ;;  %v1981_v10 = vpop.f32.mrb[58].mxu0 }
 0x2c8   :  { %v1108_v12 = vadd.f32 %v1981_v10, %v2477_v60  ;;  %v1102_v13 = vpop.f32.mrb[59].mxu0 }
 0x2c9   :  { %v1103_v14 = vadd.f32 %v2477_v60, %v1102_v13  ;;  %2032 = vmatprep.mubr.msk.f32.mxu1 %vm445_vm4, %v1155_v9 }
 0x2ca   :  { %2033 = vmatmul.mubr.msk.f32.gmra.mrb[56].mxu1 %vm445_vm4, %v1156_v11  ;;  %v1158_v17 = vmax.f32 %v1108_v12, 0.0 }
 0x2cb   :  { %v1157_v15 = vmax.f32 %v1103_v14, 0.0  ;;  %v1984_v16 = vpop.f32.mrb[60].mxu0 }
 0x2cc   :  { %v1118_v18 = vadd.f32 %v1984_v16, %v2477_v60  ;;  %v1112_v19 = vpop.f32.mrb[61].mxu0 }
 0x2cd   :  { %v1113_v20 = vadd.f32 %v2477_v60, %v1112_v19  ;;  %2035 = vmatprep.mubr.msk.f32.mxu1 %vm445_vm4, %v1157_v15 }
 0x2ce   :  { %2036 = vmatmul.mubr.msk.f32.gmra.mrb[58].mxu1 %vm445_vm4, %v1158_v17  ;;  %v1160_v22 = vmax.f32 %v1118_v18, 0.0 }
 0x2cf   :  { %v1159_v21 = vmax.f32 %v1113_v20, 0.0  ;;  %v1987_v50 = vpop.f32.mrb[62].mxu0 }
 0x2d0   :  { %v1128_v23 = vadd.f32 %v1987_v50, %v2477_v60  ;;  %v1122_v24 = vpop.f32.mrb[63].mxu0 }
 0x2d1   :  { %v1123_v26 = vadd.f32 %v2477_v60, %v1122_v24  ;;  %2038 = vmatprep.mubr.msk.f32.mxu1 %vm445_vm4, %v1159_v21 }
 0x2d2   :  { %2039 = vmatmul.mubr.msk.f32.gmra.mrb[60].mxu1 %vm445_vm4, %v1160_v22  ;;  %v1162_v28 = vmax.f32 %v1128_v23, 0.0 }
 0x2d3   :  { %v1161_v27 = vmax.f32 %v1123_v26, 0.0 }
 0x2d5   :  { %2041 = vmatprep.mubr.msk.f32.mxu1 %vm445_vm4, %v1161_v27 }
 0x2d6   :  { %2042 = vmatmul.mubr.msk.f32.gmra.mrb[62].mxu1 %vm445_vm4, %v1162_v28 }
 0x36d   :  { %v1998_v30 = vpop.f32.mrb[32].mxu1 }
 0x36e   :  { %v1342_v31 = vadd.f32 %v1998_v30, %v2546_v29  ;;  %v1336_v32 = vpop.f32.mrb[33].mxu1 }
 0x36f   :  { %v1337_v60 = vadd.f32 %v2546_v29, %v1336_v32 }
 0x370   :  { %1496 = vst [vmem:[#allocation2 + $0x8] sm:$0xff] %v1342_v31 }
 0x371   :  { %1495 = vst [vmem:[#allocation2] sm:$0xff] %v1337_v60  ;;  %v2001_v33 = vpop.f32.mrb[34].mxu1 }
 0x372   :  { %v1352_v34 = vadd.f32 %v2001_v33, %v2546_v29  ;;  %v1346_v35 = vpop.f32.mrb[35].mxu1 }
 0x373   :  { %v1347_v36 = vadd.f32 %v2546_v29, %v1346_v35 }
 0x374   :  { %1498 = vst [vmem:[#allocation2 + $0x18] sm:$0xff] %v1352_v34 }
 0x375   :  { %1497 = vst [vmem:[#allocation2 + $0x10] sm:$0xff] %v1347_v36  ;;  %v2004_v37 = vpop.f32.mrb[36].mxu1 }
 0x376   :  { %v1362_v38 = vadd.f32 %v2004_v37, %v2546_v29  ;;  %v1356_v39 = vpop.f32.mrb[37].mxu1 }
 0x377   :  { %v1357_v40 = vadd.f32 %v2546_v29, %v1356_v39 }
 0x378   :  { %1500 = vst [vmem:[#allocation2 + $0x28] sm:$0xff] %v1362_v38 }
 0x379   :  { %1499 = vst [vmem:[#allocation2 + $0x20] sm:$0xff] %v1357_v40  ;;  %v2007_v41 = vpop.f32.mrb[38].mxu1 }
 0x37a   :  { %v1372_v42 = vadd.f32 %v2007_v41, %v2546_v29  ;;  %v1366_v43 = vpop.f32.mrb[39].mxu1 }
 0x37b   :  { %v1367_v44 = vadd.f32 %v2546_v29, %v1366_v43 }
 0x37c   :  { %1502 = vst [vmem:[#allocation2 + $0x38] sm:$0xff] %v1372_v42 }
 0x37d   :  { %1501 = vst [vmem:[#allocation2 + $0x30] sm:$0xff] %v1367_v44  ;;  %v2010_v45 = vpop.f32.mrb[40].mxu1 }
 0x37e   :  { %v1382_v46 = vadd.f32 %v2010_v45, %v2546_v29  ;;  %v1376_v47 = vpop.f32.mrb[41].mxu1 }
 0x37f   :  { %v1377_v48 = vadd.f32 %v2546_v29, %v1376_v47 }
 0x380   :  { %1504 = vst [vmem:[#allocation2 + $0x48] sm:$0xff] %v1382_v46 }
 0x381   :  { %1503 = vst [vmem:[#allocation2 + $0x40] sm:$0xff] %v1377_v48  ;;  %v2013_v49 = vpop.f32.mrb[42].mxu1 }
 0x382   :  { %v1392_v51 = vadd.f32 %v2013_v49, %v2546_v29  ;;  %v1386_v52 = vpop.f32.mrb[43].mxu1 }
 0x383   :  { %v1387_v53 = vadd.f32 %v2546_v29, %v1386_v52 }
 0x384   :  { %1506 = vst [vmem:[#allocation2 + $0x58] sm:$0xff] %v1392_v51 }
 0x385   :  { %1505 = vst [vmem:[#allocation2 + $0x50] sm:$0xff] %v1387_v53  ;;  %v2016_v54 = vpop.f32.mrb[44].mxu1 }
 0x386   :  { %v1402_v55 = vadd.f32 %v2016_v54, %v2546_v29  ;;  %v1396_v56 = vpop.f32.mrb[45].mxu1 }
 0x387   :  { %v1397_v57 = vadd.f32 %v2546_v29, %v1396_v56 }
 0x388   :  { %1508 = vst [vmem:[#allocation2 + $0x68] sm:$0xff] %v1402_v55 }
 0x389   :  { %1507 = vst [vmem:[#allocation2 + $0x60] sm:$0xff] %v1397_v57  ;;  %v2019_v58 = vpop.f32.mrb[46].mxu1 }
 0x38a   :  { %v1412_v59 = vadd.f32 %v2019_v58, %v2546_v29  ;;  %v1406_v61 = vpop.f32.mrb[47].mxu1 }
 0x38b   :  { %v1407_v62 = vadd.f32 %v2546_v29, %v1406_v61 }
 0x38c   :  { %1510 = vst [vmem:[#allocation2 + $0x78] sm:$0xff] %v1412_v59 }
 0x38d   :  { %1509 = vst [vmem:[#allocation2 + $0x70] sm:$0xff] %v1407_v62  ;;  %v2022_v63 = vpop.f32.mrb[48].mxu1 }
 0x38e   :  { %v1422_v25 = vadd.f32 %v2022_v63, %v2546_v29  ;;  %v1416_v0 = vpop.f32.mrb[49].mxu1 }
 0x38f   :  { %v1417_v1 = vadd.f32 %v2546_v29, %v1416_v0 }
 0x390   :  { %1512 = vst [vmem:[#allocation2 + $0x88] sm:$0xff] %v1422_v25 }
 0x391   :  { %1511 = vst [vmem:[#allocation2 + $0x80] sm:$0xff] %v1417_v1  ;;  %v2025_v2 = vpop.f32.mrb[50].mxu1 }
 0x392   :  { %v1432_v3 = vadd.f32 %v2025_v2, %v2546_v29  ;;  %v1426_v4 = vpop.f32.mrb[51].mxu1 }
 0x393   :  { %v1427_v5 = vadd.f32 %v2546_v29, %v1426_v4 }
 0x394   :  { %1514 = vst [vmem:[#allocation2 + $0x98] sm:$0xff] %v1432_v3 }
 0x395   :  { %1513 = vst [vmem:[#allocation2 + $0x90] sm:$0xff] %v1427_v5  ;;  %v2028_v6 = vpop.f32.mrb[52].mxu1 }
 0x396   :  { %v1442_v7 = vadd.f32 %v2028_v6, %v2546_v29  ;;  %v1436_v8 = vpop.f32.mrb[53].mxu1 }
 0x397   :  { %v1437_v9 = vadd.f32 %v2546_v29, %v1436_v8 }
 0x398   :  { %1516 = vst [vmem:[#allocation2 + $0xa8] sm:$0xff] %v1442_v7 }
 0x399   :  { %1515 = vst [vmem:[#allocation2 + $0xa0] sm:$0xff] %v1437_v9  ;;  %v2031_v10 = vpop.f32.mrb[54].mxu1 }
 0x39a   :  { %v1452_v11 = vadd.f32 %v2031_v10, %v2546_v29  ;;  %v1446_v12 = vpop.f32.mrb[55].mxu1 }
 0x39b   :  { %v1447_v13 = vadd.f32 %v2546_v29, %v1446_v12 }
 0x39c   :  { %1518 = vst [vmem:[#allocation2 + $0xb8] sm:$0xff] %v1452_v11 }
 0x39d   :  { %1517 = vst [vmem:[#allocation2 + $0xb0] sm:$0xff] %v1447_v13  ;;  %v2034_v14 = vpop.f32.mrb[56].mxu1 }
 0x39e   :  { %v1462_v15 = vadd.f32 %v2034_v14, %v2546_v29  ;;  %v1456_v16 = vpop.f32.mrb[57].mxu1 }
 0x39f   :  { %v1457_v17 = vadd.f32 %v2546_v29, %v1456_v16 }
 0x3a0   :  { %1520 = vst [vmem:[#allocation2 + $0xc8] sm:$0xff] %v1462_v15 }
 0x3a1   :  { %1519 = vst [vmem:[#allocation2 + $0xc0] sm:$0xff] %v1457_v17  ;;  %v2037_v18 = vpop.f32.mrb[58].mxu1 }
 0x3a2   :  { %v1472_v19 = vadd.f32 %v2037_v18, %v2546_v29  ;;  %v1466_v20 = vpop.f32.mrb[59].mxu1 }
 0x3a3   :  { %v1467_v21 = vadd.f32 %v2546_v29, %v1466_v20 }
 0x3a4   :  { %1522 = vst [vmem:[#allocation2 + $0xd8] sm:$0xff] %v1472_v19 }
 0x3a5   :  { %1521 = vst [vmem:[#allocation2 + $0xd0] sm:$0xff] %v1467_v21  ;;  %v2040_v50 = vpop.f32.mrb[60].mxu1 }
 0x3a6   :  { %v1482_v22 = vadd.f32 %v2040_v50, %v2546_v29  ;;  %v1476_v23 = vpop.f32.mrb[61].mxu1 }
 0x3a7   :  { %v1477_v24 = vadd.f32 %v2546_v29, %v1476_v23 }
 0x3a8   :  { %1524 = vst [vmem:[#allocation2 + $0xe8] sm:$0xff] %v1482_v22 }
 0x3a9   :  { %1523 = vst [vmem:[#allocation2 + $0xe0] sm:$0xff] %v1477_v24  ;;  %v2043_v26 = vpop.f32.mrb[62].mxu1 }
 0x3aa   :  { %v1492_v27 = vadd.f32 %v2043_v26, %v2546_v29  ;;  %v1486_v28 = vpop.f32.mrb[63].mxu1 }
 0x3ab   :  { %v1487_v30 = vadd.f32 %v2546_v29, %v1486_v28 }
 0x3ac   :  { %1526 = vst [vmem:[#allocation2 + $0xf8] sm:$0xff] %v1492_v27 }
 0x3ad   :  { %1525 = vst [vmem:[#allocation2 + $0xf0] sm:$0xff] %v1487_v30 }
 0x3ae   :  { %2093 = shalt.err (!%p2090_p4)
}
 0x3af   :  { %s2094_s22 = scalar_lea.hbm %s2601_s9, 4096 }
 0x3b0   :  { %p2095_p5 = scmp.ne.s32.totalorder %s2601_s9, %s2094_s22  ;;  %p2098_p6 = scmp.lt.u32.totalorder %s2094_s22, %s2601_s9 }
 0x3b2   :  { %p2100_p7 = pnand %p2098_p6, %p2095_p5 }
 0x3b4   :  { %2103 = shalt.err (!%p2100_p7)
}
 0x3b5   :  { %s2108_s0 = smov 128   ;;  %s2109_s26 = smov 8  }
 0x3b6   :  { %1538 = dma.vmem_to_hbm [thread:$0]  %s1533_s18, 4096, %s2601_s9, [#allocation3], %s2108_s0, %s2108_s0, %s2109_s26  }
 0x3b7   :  { %2104 = dma.done.wait [#allocation3], 4096  }
 0x3b8   :  { %2105 = vsyncadd [#allocation3], 4294963200 }
 0x3b9   :  { %1542 = vsyncpa [#allocation3], 1 }

</bundles_post_ra>
